<compile_context>
chip_gen: v7x
topology: tpu7x:2x2x1
jax: 0.10.0
libtpu: 0.0.40
codegen_flags: <defaults>
</compile_context>

<pallas_src>
import functools

import jax
import jax.numpy as jnp
from jax.experimental import pallas as pl
from jax.experimental.pallas import tpu as pltpu


def _top1_max_kernel(logits_ref, mask_or_idx_ref, diag_ref, out_ref,
                     m_sc, l_sc, num_sc, cnt_sc,
                     *, total_rows, total_cols, block_cols,
                     mask_from_index, use_bf16_sigmoid):
    """Processes one (TR, TC) tile; accumulates online-softmax row state in
    VMEM scratch across the column-chunk grid axis and writes a lane-dense
    (1, 1, 128) per-row-block partial sum on the last column chunk."""
    i = pl.program_id(0)
    j = pl.program_id(1)
    n_col_blocks = pl.num_programs(1)

    @pl.when(j == 0)
    def _():
        m_sc[...] = jnp.full_like(m_sc, -jnp.inf)
        l_sc[...] = jnp.zeros_like(l_sc)
        num_sc[...] = jnp.zeros_like(num_sc)
        cnt_sc[...] = jnp.zeros_like(cnt_sc)

    logits = logits_ref[...].astype(jnp.float32)            # (TR, TC)
    pos = diag_ref[...].astype(jnp.float32)                 # (TR, 1)
    tr, tc = logits.shape

    # Column-validity mask for a ragged last column chunk (the softmax
    # denominator runs over all real columns, not only negatives).
    col_ids = j * block_cols + jax.lax.broadcasted_iota(jnp.int32, (tr, tc), 1)
    col_valid = col_ids < total_cols

    if mask_from_index:
        # mask_or_idx_ref: (TR, 1) int32 positive-column index.
        neg = jnp.logical_and(col_valid, col_ids != mask_or_idx_ref[...])
    else:
        # mask_or_idx_ref: (TR, TC) bool negative mask.
        neg = jnp.logical_and(col_valid, mask_or_idx_ref[...])

    # Online (flash-style) softmax over column chunks.
    s = jnp.where(col_valid, logits, -jnp.inf)
    m_prev = m_sc[...]
    m_new = jnp.maximum(m_prev, jnp.max(s, axis=1, keepdims=True))
    alpha = jnp.exp(m_prev - m_new)
    e = jnp.exp(s - m_new)                                   # 0 at padded cols

    # TOP1-max per-element loss: sigmoid(logits - pos) + sigmoid(logits ** 2).
    if use_bf16_sigmoid:
        lb = logits.astype(jnp.bfloat16)
        pb = pos.astype(jnp.bfloat16)
        loss_elem = (jax.nn.sigmoid(lb - pb)
                     + jax.nn.sigmoid(lb * lb)).astype(jnp.float32)
    else:
        loss_elem = jax.nn.sigmoid(logits - pos) + jax.nn.sigmoid(logits * logits)

    l_sc[...] = alpha * l_sc[...] + jnp.sum(e, axis=1, keepdims=True)
    num_sc[...] = alpha * num_sc[...] + jnp.sum(
        jnp.where(neg, e * loss_elem, 0.0), axis=1, keepdims=True)
    cnt_sc[...] = cnt_sc[...] + jnp.sum(
        jnp.where(neg, 1.0, 0.0), axis=1, keepdims=True)
    m_sc[...] = m_new

    @pl.when(j == n_col_blocks - 1)
    def _():
        # softmax-masked mean over negatives: (sum e*loss*mask / sum e) / n_neg.
        row_loss = num_sc[...] / (l_sc[...] * cnt_sc[...])
        # Discard padded rows of a ragged last row tile.  Keep this as a
        # select (not a multiply) so undefined/NaN padding bytes cannot leak.
        local_row = jax.lax.broadcasted_iota(jnp.int32, (tr, 1), 0)
        valid_row = (i * tr + local_row) < total_rows
        row_loss = jnp.where(valid_row, row_loss, 0.0)
        partial = jnp.sum(row_loss)
        out_ref[...] = jnp.broadcast_to(partial, out_ref.shape).astype(jnp.float32)


def _vmem_capacity_bytes():
    try:
        return int(pltpu.get_tpu_info().vmem_capacity_bytes)
    except Exception:
        return 64 * 1024 * 1024       # conservative (v7x-class) fallback


def _supports_bf16_eup():
    """bf16 VPU/EUP exists on v6e/v7x; v5e and older compute in f32."""
    try:
        kind = jax.devices()[0].device_kind.lower()
    except Exception:
        return False
    if "tpu" not in kind:
        return False
    return not any(t in kind for t in ("v2", "v3", "v4", "v5"))


def _choose_tiles(num_rows, num_cols, itemsize, vmem_capacity, mask_from_index):
    """Pick (row_tile, col_tile, vmem_limit) so double-buffered inputs plus
    in-kernel f32 temporaries fit comfortably in scoped VMEM on every gen."""
    # Per-(TR x TC)-element VMEM cost: double-buffered logits (+ bool mask when
    # streamed) plus ~4 f32 slabs of compiler temporaries (exp, loss_elem,
    # masked product, casts).
    mask_b = 0 if mask_from_index else 1
    bytes_per_elem = 2 * (itemsize + mask_b) + 16

    is_small_vmem = vmem_capacity <= 64 * 1024 * 1024     # v7x-class core
    if is_small_vmem:
        data_budget = 20 * 1024 * 1024
        vmem_limit = 30 * 1024 * 1024
    else:                                                  # v5e / v6e (128 MiB)
        data_budget = 36 * 1024 * 1024
        vmem_limit = 48 * 1024 * 1024

    max_elems = max(data_budget // bytes_per_elem, 8 * 128)

    # Sub-32-bit dtypes pack along sublanes; the bool mask needs 32-row tiles
    # when its row block is not the full array.
    d_align = {4: 8, 2: 16, 1: 32}.get(itemsize, 8)
    row_align = d_align if mask_from_index else max(d_align, 32)

    # Column tile: keep the full row when it fits with at least an 8-row tile,
    # otherwise chunk C into 128-aligned slices (online softmax over chunks).
    if num_cols <= max_elems // 8:
        tc = num_cols
    else:
        tc = max(128, ((max_elems // 8) // 128) * 128)

    # Row tile: as large as fits (fewer grid steps), capped at 4096 rows.
    max_tr = min(max_elems // tc, 4096)
    max_tr = max((max_tr // row_align) * row_align, row_align)

    if num_rows <= max_tr:
        tr = num_rows                       # single block covering all rows
        # On v7x-class chips make sure both TensorCores get a row block.
        if is_small_vmem and num_rows > row_align:
            cand = ((pl.cdiv(num_rows, 2) + row_align - 1) // row_align) * row_align
            if cand < num_rows:
                tr = cand
    else:
        tr = max_tr
    return tr, tc, vmem_limit


def top1_max_loss(logits_scores, negative_mask=None, *, positive_col=None):
    """TOP1-max loss.

    Args:
      logits_scores: (R, C) float scores (C >= R; column r is row r's positive).
      negative_mask: (R, C) bool, arbitrary negative-sample mask (module spec).
      positive_col:  (R,) int32, optional fast path when the mask is exactly
                     `col != positive_col` (skips streaming the (R, C) mask).
    Returns scalar f32 loss.
    """
    if (negative_mask is None) == (positive_col is None):
        raise ValueError("pass exactly one of negative_mask / positive_col")

    R, C = logits_scores.shape
    mask_from_index = positive_col is not None

    # positives = diag(logits); tiny (R, 1) side input computed once here.
    diag = jnp.diagonal(logits_scores).reshape(R, 1)

    itemsize = jnp.dtype(logits_scores.dtype).itemsize
    vmem_capacity = _vmem_capacity_bytes()
    tr, tc, vmem_limit = _choose_tiles(R, C, itemsize, vmem_capacity,
                                       mask_from_index)
    num_row_blocks = pl.cdiv(R, tr)
    num_col_blocks = pl.cdiv(C, tc)

    use_bf16_sigmoid = _supports_bf16_eup()

    kernel = functools.partial(
        _top1_max_kernel,
        total_rows=R, total_cols=C, block_cols=tc,
        mask_from_index=mask_from_index, use_bf16_sigmoid=use_bf16_sigmoid)

    if mask_from_index:
        mask_arg = positive_col.astype(jnp.int32).reshape(R, 1)
        mask_spec = pl.BlockSpec((tr, 1), lambda i, j: (i, 0))
        mask_bytes = R * 4
    else:
        mask_arg = negative_mask
        mask_spec = pl.BlockSpec((tr, tc), lambda i, j: (i, j))
        mask_bytes = R * C                       # bool = 1 B/elem

    cost = pl.CostEstimate(
        flops=10 * R * C,
        transcendentals=3 * R * C,               # exp + 2 sigmoids per element
        bytes_accessed=R * C * itemsize + mask_bytes
                       + R * itemsize + num_row_blocks * 128 * 4)

    partials = pl.pallas_call(
        kernel,
        out_shape=jax.ShapeDtypeStruct((num_row_blocks, 1, 128), jnp.float32),
        grid=(num_row_blocks, num_col_blocks),
        in_specs=[
            pl.BlockSpec((tr, tc), lambda i, j: (i, j)),   # logits (orig dtype)
            mask_spec,                                     # bool mask OR pos-col idx
            pl.BlockSpec((tr, 1), lambda i, j: (i, 0)),    # diag positives
        ],
        out_specs=pl.BlockSpec((1, 1, 128), lambda i, j: (i, 0, 0)),
        scratch_shapes=[pltpu.VMEM((tr, 1), jnp.float32)] * 4,  # m, l, num, cnt
        compiler_params=pltpu.CompilerParams(
            dimension_semantics=("parallel", "arbitrary"),
            vmem_limit_bytes=vmem_limit,
        ),
        cost_estimate=cost,
    )(logits_scores, mask_arg, diag)

    return jnp.sum(partials[:, 0, 0]) / jnp.float32(R)


def _reference(logits_scores, negative_mask):
    # Pure-JAX reference mirroring the PyTorch forward.
    positives = jnp.diagonal(logits_scores)[:, None]
    diff = positives - logits_scores
    penalization = jax.nn.sigmoid(logits_scores ** 2)
    loss = jax.nn.sigmoid(-diff) + penalization
    logit_softmax = jax.nn.softmax(logits_scores, axis=1)
    loss = logit_softmax * loss
    loss = jnp.where(negative_mask, loss, 0.0)
    loss = loss.sum(1) / negative_mask.sum(1)
    return jnp.mean(loss)


if __name__ == "__main__":
    key = jax.random.PRNGKey(0)
    R, C = 16, 48  # 16 positive targets, 48 samples (in-batch + additional)
    logits = jax.random.normal(key, (R, C), dtype=jnp.float32)

    row_ids = jnp.arange(R)[:, None]
    col_ids = jnp.arange(C)[None, :]
    structural = row_ids != col_ids                       # col != positive column
    # General (non-structural) mask: drop some additional-sample columns too;
    # every row keeps plenty of negatives.
    general_mask = structural & ((col_ids % 5) != 3)

    # bf16 sigmoids (v6e/v7x) introduce ~2e-3 relative error; exact otherwise.
    tol = 5e-3 if _supports_bf16_eup() else 1e-5

    # Path 1: explicit (R, C) boolean mask -- the module's contract.
    out1 = jax.block_until_ready(top1_max_loss(logits, general_mask))
    ref1 = _reference(logits, general_mask)
    assert jnp.allclose(out1, ref1, atol=tol, rtol=tol), (out1, ref1)

    # Path 2: structural mask given as a per-row positive-column index
    # (skips the (R, C) mask HBM stream).
    out2 = jax.block_until_ready(
        top1_max_loss(logits, positive_col=jnp.arange(R, dtype=jnp.int32)))
    ref2 = _reference(logits, structural)
    assert jnp.allclose(out2, ref2, atol=tol, rtol=tol), (out2, ref2)

    print("KERNEL_OK")
</pallas_src>

<mosaic_0001>
module attributes {stable_mosaic.version = 11 : i64} {
  func.func @_top1_max_kernel(%arg0: i32, %arg1: i32, %arg2: memref<16x48xf32, #tpu.memory_space<vmem>>, %arg3: memref<16x48xi32, #tpu.memory_space<vmem>>, %arg4: memref<16x1xf32, #tpu.memory_space<vmem>>, %arg5: memref<1x1x128xf32, #tpu.memory_space<vmem>>, %arg6: memref<16x1xf32, #tpu.memory_space<vmem>>, %arg7: memref<16x1xf32, #tpu.memory_space<vmem>>, %arg8: memref<16x1xf32, #tpu.memory_space<vmem>>, %arg9: memref<16x1xf32, #tpu.memory_space<vmem>>) attributes {dimension_semantics = [#tpu.dimension_semantics<parallel>, #tpu.dimension_semantics<arbitrary>], iteration_bounds = array<i64: 1, 1>, scalar_prefetch = 0 : i64, scratch_operands = 4 : i64, tpu.core_type = #tpu.core_type<tc>, window_params = [{transform_indices = @transform_0, window_bounds = array<i64: 16, 48>}, {transform_indices = @transform_1, window_bounds = array<i64: 16, 48>}, {transform_indices = @transform_2, window_bounds = array<i64: 16, 1>}, {transform_indices = @transform_3, window_bounds = array<i64: 1, 1, 128>}]} {
    %c0_i32 = arith.constant 0 : i32
    %0 = arith.cmpi eq, %arg1, %c0_i32 : i32
    %1 = arith.extui %0 : i1 to i32
    %c0_i32_0 = arith.constant 0 : i32
    %2 = arith.cmpi ne, %1, %c0_i32_0 : i32
    scf.if %2 {
      %cst_35 = arith.constant 0xFF800000 : f32
      %66 = vector.broadcast %cst_35 : f32 to vector<16x1xf32>
      %c0_36 = arith.constant 0 : index
      %c0_37 = arith.constant 0 : index
      %67 = vector.load %arg6[%c0_36, %c0_37] : memref<16x1xf32, #tpu.memory_space<vmem>>, vector<16x1xf32>
      tpu.vector_store %arg6[%c0_36, %c0_37], %66 {strides = array<i32>} : memref<16x1xf32, #tpu.memory_space<vmem>>, vector<16x1xf32>,
      %cst_38 = arith.constant 0.000000e+00 : f32
      %68 = vector.broadcast %cst_38 : f32 to vector<16x1xf32>
      %c0_39 = arith.constant 0 : index
      %c0_40 = arith.constant 0 : index
      %69 = vector.load %arg7[%c0_39, %c0_40] : memref<16x1xf32, #tpu.memory_space<vmem>>, vector<16x1xf32>
      tpu.vector_store %arg7[%c0_39, %c0_40], %68 {strides = array<i32>} : memref<16x1xf32, #tpu.memory_space<vmem>>, vector<16x1xf32>,
      %cst_41 = arith.constant 0.000000e+00 : f32
      %70 = vector.broadcast %cst_41 : f32 to vector<16x1xf32>
      %c0_42 = arith.constant 0 : index
      %c0_43 = arith.constant 0 : index
      %71 = vector.load %arg8[%c0_42, %c0_43] : memref<16x1xf32, #tpu.memory_space<vmem>>, vector<16x1xf32>
      tpu.vector_store %arg8[%c0_42, %c0_43], %70 {strides = array<i32>} : memref<16x1xf32, #tpu.memory_space<vmem>>, vector<16x1xf32>,
      %cst_44 = arith.constant 0.000000e+00 : f32
      %72 = vector.broadcast %cst_44 : f32 to vector<16x1xf32>
      %c0_45 = arith.constant 0 : index
      %c0_46 = arith.constant 0 : index
      %73 = vector.load %arg9[%c0_45, %c0_46] : memref<16x1xf32, #tpu.memory_space<vmem>>, vector<16x1xf32>
      tpu.vector_store %arg9[%c0_45, %c0_46], %72 {strides = array<i32>} : memref<16x1xf32, #tpu.memory_space<vmem>>, vector<16x1xf32>,
    } else {
    }
    %c0 = arith.constant 0 : index
    %c0_1 = arith.constant 0 : index
    %3 = vector.load %arg2[%c0, %c0_1] : memref<16x48xf32, #tpu.memory_space<vmem>>, vector<16x48xf32>
    %c0_2 = arith.constant 0 : index
    %c0_3 = arith.constant 0 : index
    %4 = vector.load %arg4[%c0_2, %c0_3] : memref<16x1xf32, #tpu.memory_space<vmem>>, vector<16x1xf32>
    %c48_i32 = arith.constant 48 : i32
    %5 = arith.muli %arg1, %c48_i32 : i32
    %6 = tpu.iota {dimensions = array<i32: 1>} : vector<16x48xi32>
    %7 = vector.broadcast %5 : i32 to vector<16x48xi32>
    %8 = arith.addi %7, %6 : vector<16x48xi32>
    %c48_i32_4 = arith.constant 48 : i32
    %9 = vector.broadcast %c48_i32_4 : i32 to vector<16x48xi32>
    %10 = arith.cmpi slt, %8, %9 : vector<16x48xi32>
    %c0_5 = arith.constant 0 : index
    %c0_6 = arith.constant 0 : index
    %11 = vector.load %arg3[%c0_5, %c0_6] : memref<16x48xi32, #tpu.memory_space<vmem>>, vector<16x48xi32>
    %cst = arith.constant dense<0> : vector<16x48xi32>
    %12 = arith.cmpi ne, %11, %cst : vector<16x48xi32>
    %13 = arith.andi %10, %12 : vector<16x48xi1>
    %cst_7 = arith.constant 0xFF800000 : f32
    %14 = vector.broadcast %cst_7 : f32 to vector<16x48xf32>
    %15 = arith.select %10, %3, %14 : vector<16x48xi1>, vector<16x48xf32>
    %c0_8 = arith.constant 0 : index
    %c0_9 = arith.constant 0 : index
    %16 = vector.load %arg6[%c0_8, %c0_9] : memref<16x1xf32, #tpu.memory_space<vmem>>, vector<16x1xf32>
    %cst_10 = arith.constant dense<0xFF800000> : vector<16xf32>
    %17 = vector.multi_reduction <maximumf>, %15, %cst_10 [1] : vector<16x48xf32> to vector<16xf32>
    %18 = vector.shape_cast %17 : vector<16xf32> to vector<16x1xf32>
    %19 = arith.maximumf %16, %18 : vector<16x1xf32>
    %20 = arith.subf %16, %19 : vector<16x1xf32>
    %21 = math.exp %20 : vector<16x1xf32>
    %22 = vector.broadcast %19 : vector<16x1xf32> to vector<16x48xf32>
    %23 = arith.subf %15, %22 : vector<16x48xf32>
    %24 = math.exp %23 : vector<16x48xf32>
    %25 = vector.broadcast %4 : vector<16x1xf32> to vector<16x48xf32>
    %26 = arith.subf %3, %25 : vector<16x48xf32>
    %27 = arith.negf %26 : vector<16x48xf32>
    %28 = math.exp %27 : vector<16x48xf32>
    %cst_11 = arith.constant 1.000000e+00 : f32
    %29 = vector.broadcast %cst_11 : f32 to vector<16x48xf32>
    %30 = arith.addf %29, %28 : vector<16x48xf32>
    %31 = arith.divf %29, %30 : vector<16x48xf32>
    %32 = arith.mulf %3, %3 : vector<16x48xf32>
    %33 = arith.negf %32 : vector<16x48xf32>
    %34 = math.exp %33 : vector<16x48xf32>
    %cst_12 = arith.constant 1.000000e+00 : f32
    %35 = vector.broadcast %cst_12 : f32 to vector<16x48xf32>
    %36 = arith.addf %35, %34 : vector<16x48xf32>
    %37 = arith.divf %35, %36 : vector<16x48xf32>
    %38 = arith.addf %31, %37 : vector<16x48xf32>
    %c0_13 = arith.constant 0 : index
    %c0_14 = arith.constant 0 : index
    %39 = vector.load %arg7[%c0_13, %c0_14] : memref<16x1xf32, #tpu.memory_space<vmem>>, vector<16x1xf32>
    %40 = arith.mulf %21, %39 : vector<16x1xf32>
    %cst_15 = arith.constant dense<0.000000e+00> : vector<16xf32>
    %41 = vector.multi_reduction <add>, %24, %cst_15 [1] : vector<16x48xf32> to vector<16xf32>
    %42 = vector.shape_cast %41 : vector<16xf32> to vector<16x1xf32>
    %43 = arith.addf %40, %42 : vector<16x1xf32>
    %c0_16 = arith.constant 0 : index
    %c0_17 = arith.constant 0 : index
    %44 = vector.load %arg7[%c0_16, %c0_17] : memref<16x1xf32, #tpu.memory_space<vmem>>, vector<16x1xf32>
    tpu.vector_store %arg7[%c0_16, %c0_17], %43 {strides = array<i32>} : memref<16x1xf32, #tpu.memory_space<vmem>>, vector<16x1xf32>,
    %c0_18 = arith.constant 0 : index
    %c0_19 = arith.constant 0 : index
    %45 = vector.load %arg8[%c0_18, %c0_19] : memref<16x1xf32, #tpu.memory_space<vmem>>, vector<16x1xf32>
    %46 = arith.mulf %21, %45 : vector<16x1xf32>
    %47 = arith.mulf %24, %38 : vector<16x48xf32>
    %cst_20 = arith.constant 0.000000e+00 : f32
    %48 = vector.broadcast %cst_20 : f32 to vector<16x48xf32>
    %49 = arith.select %13, %47, %48 : vector<16x48xi1>, vector<16x48xf32>
    %cst_21 = arith.constant dense<0.000000e+00> : vector<16xf32>
    %50 = vector.multi_reduction <add>, %49, %cst_21 [1] : vector<16x48xf32> to vector<16xf32>
    %51 = vector.shape_cast %50 : vector<16xf32> to vector<16x1xf32>
    %52 = arith.addf %46, %51 : vector<16x1xf32>
    %c0_22 = arith.constant 0 : index
    %c0_23 = arith.constant 0 : index
    %53 = vector.load %arg8[%c0_22, %c0_23] : memref<16x1xf32, #tpu.memory_space<vmem>>, vector<16x1xf32>
    tpu.vector_store %arg8[%c0_22, %c0_23], %52 {strides = array<i32>} : memref<16x1xf32, #tpu.memory_space<vmem>>, vector<16x1xf32>,
    %c0_24 = arith.constant 0 : index
    %c0_25 = arith.constant 0 : index
    %54 = vector.load %arg9[%c0_24, %c0_25] : memref<16x1xf32, #tpu.memory_space<vmem>>, vector<16x1xf32>
    %cst_26 = arith.constant 1.000000e+00 : f32
    %cst_27 = arith.constant 0.000000e+00 : f32
    %55 = vector.broadcast %cst_26 : f32 to vector<16x48xf32>
    %56 = vector.broadcast %cst_27 : f32 to vector<16x48xf32>
    %57 = arith.select %13, %55, %56 : vector<16x48xi1>, vector<16x48xf32>
    %cst_28 = arith.constant dense<0.000000e+00> : vector<16xf32>
    %58 = vector.multi_reduction <add>, %57, %cst_28 [1] : vector<16x48xf32> to vector<16xf32>
    %59 = vector.shape_cast %58 : vector<16xf32> to vector<16x1xf32>
    %60 = arith.addf %54, %59 : vector<16x1xf32>
    %c0_29 = arith.constant 0 : index
    %c0_30 = arith.constant 0 : index
    %61 = vector.load %arg9[%c0_29, %c0_30] : memref<16x1xf32, #tpu.memory_space<vmem>>, vector<16x1xf32>
    tpu.vector_store %arg9[%c0_29, %c0_30], %60 {strides = array<i32>} : memref<16x1xf32, #tpu.memory_space<vmem>>, vector<16x1xf32>,
    %c0_31 = arith.constant 0 : index
    %c0_32 = arith.constant 0 : index
    %62 = vector.load %arg6[%c0_31, %c0_32] : memref<16x1xf32, #tpu.memory_space<vmem>>, vector<16x1xf32>
    tpu.vector_store %arg6[%c0_31, %c0_32], %19 {strides = array<i32>} : memref<16x1xf32, #tpu.memory_space<vmem>>, vector<16x1xf32>,
    %c0_i32_33 = arith.constant 0 : i32
    %63 = arith.cmpi eq, %arg1, %c0_i32_33 : i32
    %64 = arith.extui %63 : i1 to i32
    %c0_i32_34 = arith.constant 0 : i32
    %65 = arith.cmpi ne, %64, %c0_i32_34 : i32
    scf.if %65 {
      %c0_35 = arith.constant 0 : index
      %c0_36 = arith.constant 0 : index
      %66 = vector.load %arg8[%c0_35, %c0_36] : memref<16x1xf32, #tpu.memory_space<vmem>>, vector<16x1xf32>
      %c0_37 = arith.constant 0 : index
      %c0_38 = arith.constant 0 : index
      %67 = vector.load %arg7[%c0_37, %c0_38] : memref<16x1xf32, #tpu.memory_space<vmem>>, vector<16x1xf32>
      %c0_39 = arith.constant 0 : index
      %c0_40 = arith.constant 0 : index
      %68 = vector.load %arg9[%c0_39, %c0_40] : memref<16x1xf32, #tpu.memory_space<vmem>>, vector<16x1xf32>
      %69 = arith.mulf %67, %68 : vector<16x1xf32>
      %70 = arith.divf %66, %69 : vector<16x1xf32>
      %71 = tpu.iota {dimensions = array<i32: 0>} : vector<16x1xi32>
      %c16_i32 = arith.constant 16 : i32
      %72 = arith.muli %arg0, %c16_i32 : i32
      %73 = vector.broadcast %72 : i32 to vector<16x1xi32>
      %74 = arith.addi %73, %71 : vector<16x1xi32>
      %c16_i32_41 = arith.constant 16 : i32
      %75 = vector.broadcast %c16_i32_41 : i32 to vector<16x1xi32>
      %76 = arith.cmpi slt, %74, %75 : vector<16x1xi32>
      %cst_42 = arith.constant 0.000000e+00 : f32
      %77 = vector.broadcast %cst_42 : f32 to vector<16x1xf32>
      %78 = arith.select %76, %70, %77 : vector<16x1xi1>, vector<16x1xf32>
      %79 = vector.shape_cast %78 : vector<16x1xf32> to vector<1x16x1xf32>
      %cst_43 = arith.constant dense<0.000000e+00> : vector<1xf32>
      %80 = vector.multi_reduction <add>, %79, %cst_43 [1, 2] : vector<1x16x1xf32> to vector<1xf32>
      %81 = vector.shape_cast %80 : vector<1xf32> to vector<1x1x1xf32>
      %82 = vector.extract %81[0, 0, 0] : f32 from vector<1x1x1xf32>
      %83 = vector.broadcast %82 : f32 to vector<1x1x128xf32>
      %c0_44 = arith.constant 0 : index
      %c0_45 = arith.constant 0 : index
      %c0_46 = arith.constant 0 : index
      %84 = vector.load %arg5[%c0_44, %c0_45, %c0_46] : memref<1x1x128xf32, #tpu.memory_space<vmem>>, vector<1x1x128xf32>
      tpu.vector_store %arg5[%c0_44, %c0_45, %c0_46], %83 {strides = array<i32>} : memref<1x1x128xf32, #tpu.memory_space<vmem>>, vector<1x1x128xf32>,
    } else {
    }
    return
  }
  func.func @transform_0(%arg0: i32, %arg1: i32) -> (i32, i32) {
    %c0_i32 = arith.constant 0 : i32
    return %arg0, %arg1 : i32, i32
  }
  func.func @transform_1(%arg0: i32, %arg1: i32) -> (i32, i32) {
    %c0_i32 = arith.constant 0 : i32
    return %arg0, %arg1 : i32, i32
  }
  func.func @transform_2(%arg0: i32, %arg1: i32) -> (i32, i32) {
    %c0_i32 = arith.constant 0 : i32
    %c0_i32_0 = arith.constant 0 : i32
    return %arg0, %c0_i32 : i32, i32
  }
  func.func @transform_3(%arg0: i32, %arg1: i32) -> (i32, i32, i32) {
    %c0_i32 = arith.constant 0 : i32
    %c0_i32_0 = arith.constant 0 : i32
    %c0_i32_1 = arith.constant 0 : i32
    return %arg0, %c0_i32, %c0_i32_0 : i32, i32, i32
  }
}

</mosaic_0001>

<bundles_post_ra>
// kernel: tpu_custom_call.1
= control target key start
LH: loop header
LB: loop body
LE: loop exit
PB: predicated region body
PF: predicated region fallthrough
CT: control target
= control target key end

     0   :  { %v33_v0 = vlaneseq  ;;  %v286_v2 = vmov 0   ;;  %s429_s0 = inlined_call_operand.vmem [shape: f32[16,48], index: 0, kind: input, shape index: {}]   ;;  %s430_s1 = inlined_call_operand.vmem [shape: s32[16,48], index: 1, kind: input, shape index: {}]   ;;  %s431_s2 = inlined_call_operand.vmem [shape: f32[16,1], index: 2, kind: input, shape index: {}]   ;;  %s432_s3 = inlined_call_operand.hbm [shape: f32[1,1,128], index: 3, kind: output, shape index: {}]  }
   0x1   :  { %v30_v1 = vld [vmem:[%s431_s2] sm:$0xff]  ;;  %232 = vset.pattern.permute.xlu1 %v286_v2  ;;  %233 = vset.pattern.permute.xlu0 %v286_v2 }
   0x2   :  { %8 = vsyncpa [#allocation7], 0  ;;  %v28_v3 = vld [vmem:[%s429_s0] sm:$0xff]  ;;  %v316_v4 = vand.u32 127, %v33_v0  ;;  %v29_v5 = vld [vmem:[%s429_s0 + $0x8] sm:$0xff]  ;;  %81 = vperm.xlu1 %232, %v30_v1   ;;  %vm48_vm0 = vcmask 392192  }
   0x3   :  { %v31_v6 = vld [vmem:[%s431_s2 + $0x8] sm:$0xff]  ;;  %vm19_vm2 = vcmask 7168   ;;  %v287_v11 = vmov -inf   ;;  %v288_v12 = vmov 0.0   ;;  %v38_v21 = vld [vmem:[%s430_s1] sm:$0xff]  ;;  %v103_v26 = vmul.f32 %v28_v3, %v28_v3 }
   0x4   :  { %vm37_vm1 = vcmp.lt.s32.totalorder %v316_v4, 48  ;;  %20 = vst.msk [vmem:[#allocation2] sm:$0xff] %vm19_vm2, %v287_v11  ;;  %21 = vst.msk [vmem:[#allocation2 + $0x8] sm:$0xff] %vm19_vm2, %v287_v11  ;;  %vm40_vm3 = vcmp.ne.s32.totalorder %v38_v21, 0  ;;  %v104_v30 = vmul.f32 %v29_v5, %v29_v5  ;;  %v39_v49 = vld [vmem:[%s430_s1 + $0x8] sm:$0xff]  ;;  %s289_s1 = smov [#allocation6]  }
   0x5   :  { %v44_v7 = vsel %vm37_vm1, %v28_v3, -inf  ;;  %v329_v8 = vsel %vm37_vm1, %v29_v5, -inf  ;;  %22 = vst.msk [vmem:[#allocation3] sm:$0xff] %vm19_vm2, %v288_v12  ;;  %23 = vst.msk [vmem:[#allocation3 + $0x8] sm:$0xff] %vm19_vm2, %v288_v12  ;;  %v224_v29 = vmul.f32 -1.442695, %v103_v26 }
   0x6   :  { %v49_v9 = vsel %vm48_vm0, %v44_v7, -inf  ;;  %86 = vperm.xlu1 %232, %v31_v6   ;;  %v52_v10 = vsel %vm48_vm0, %v329_v8, -inf  ;;  %24 = vst.msk [vmem:[#allocation4] sm:$0xff] %vm19_vm2, %v288_v12  ;;  %25 = vst.msk [vmem:[#allocation4 + $0x8] sm:$0xff] %vm19_vm2, %v288_v12  ;;  %v225_v33 = vmul.f32 -1.442695, %v104_v30 }
   0x7   :  { %50 = vmax.xlane.f32.xlu0 %v49_v9  ;;  %26 = vst.msk [vmem:[#allocation5] sm:$0xff] %vm19_vm2, %v288_v12  ;;  %27 = vst.msk [vmem:[#allocation5 + $0x8] sm:$0xff] %vm19_vm2, %v288_v12  ;;  %234 = vpow2.f32 %v224_v29  ;;  %vm41_vm5 = vcmp.ne.s32.totalorder %v39_v49, 0  ;;  %s214_s22 = sshll.u32 %s289_s1, 4  ;;  %s215_s22 = int_to_ptr.vmem [resolvable:$true] %s214_s22 }
   0x8   :  { %vm373_vm4 = vmand %vm37_vm1, %vm40_vm3  ;;  %s262_s24 = scalar_lea.vmem %s215_s22, 16  ;;  %s266_s25 = scalar_lea.vmem %s215_s22, 32 }
   0x9   :  { %v154_v23 = vsel %vm373_vm4, 1.0, %v288_v12  ;;  %vm388_vm6 = vmand %vm37_vm1, %vm41_vm5  ;;  %p263_p0 = scmp.ne.s32.totalorder %s215_s22, %s262_s24  ;;  %p267_p1 = scmp.lt.s32.totalorder %s215_s22, %s215_s22 }
   0xa   :  { %v156_v24 = vsel %vm48_vm0, %v154_v23, 0.0  ;;  %v155_v59 = vsel %vm388_vm6, 1.0, %v288_v12  ;;  %p268_p2 = scmp.lt.s32.totalorder %s266_s25, %s262_s24 }
   0xb   :  { %53 = vmax.xlane.f32.xlu0 %v52_v10  ;;  %v348_v13 = vld [vmem:[#allocation2] sm:$0xff]  ;;  %v353_v16 = vld [vmem:[#allocation2 + $0x8] sm:$0xff]  ;;  %v159_v63 = vsel %vm48_vm0, %v155_v59, 0.0 }
   0xc   :  { %v119_v11 = vld [vmem:[#allocation3] sm:$0xff]  ;;  %v120_v21 = vld [vmem:[#allocation3 + $0x8] sm:$0xff]  ;;  %p269_p3 = por %p268_p2, %p267_p1 }
   0xe   :  { %p270_p4 = pnand %p269_p3, %p263_p0 }
  0x11   :  { %v235_v35 = vpop.eup %234 }
  0x12   :  { %v111_v37 = vadd.f32 1.0, %v235_v35 }
  0x81   :  { %v82_v25 = vpop.permute.xlu1 %81 }
  0x82   :  { %v89_v27 = vsub.f32 %v28_v3, %v82_v25 }
  0x84   :  { %v222_v31 = vmul.f32 -1.442695, %v89_v27 }
  0x85   :  { %v87_v28 = vpop.permute.xlu1 %86 }
  0x86   :  { %v90_v32 = vsub.f32 %v29_v5, %v87_v28  ;;  %236 = vpow2.f32 %v222_v31  ;;  %v152_v5 = vld [vmem:[#allocation5] sm:$0xff]  ;;  %v135_v28 = vld [vmem:[#allocation4 + $0x8] sm:$0xff] }
  0x87   :  { %238 = vpow2.f32 %v225_v33 }
  0x88   :  { %v223_v34 = vmul.f32 -1.442695, %v90_v32 }
  0x8a   :  { %240 = vpow2.f32 %v223_v34 }
  0x8b   :  { %242 = vrcp.f32 %v111_v37 }
  0x90   :  { %v237_v36 = vpop.eup %236 }
  0x91   :  { %v239_v38 = vpop.eup %238  ;;  %v97_v39 = vadd.f32 1.0, %v237_v36 }
  0x92   :  { %v112_v43 = vadd.f32 1.0, %v239_v38 }
  0x93   :  { %244 = vrcp.f32 %v97_v39 }
  0x94   :  { %v51_v14 = vpop.xlane.xlu0 %50  ;;  %v241_v41 = vpop.eup %240 }
  0x95   :  { %v351_v15 = vmax.f32 %v348_v13, %v51_v14  ;;  %v98_v45 = vadd.f32 1.0, %v241_v41  ;;  %v243_v50 = vpop.eup %242 }
  0x97   :  { %v57_v17 = vsub.f32 %v348_v13, %v351_v15  ;;  %166 = vst.msk [vmem:[#allocation2] sm:$0xff] %vm19_vm2, %v351_v15  ;;  %65 = vperm.xlu0 %233, %v351_v15   ;;  %v153_v13 = vld [vmem:[#allocation5 + $0x8] sm:$0xff] }
  0x98   :  { %v54_v18 = vpop.xlane.xlu0 %53 }
  0x99   :  { %v361_v19 = vmax.f32 %v353_v16, %v54_v18 }
  0x9b   :  { %v58_v20 = vsub.f32 %v353_v16, %v361_v19  ;;  %167 = vst.msk [vmem:[#allocation2 + $0x8] sm:$0xff] %vm19_vm2, %v361_v19  ;;  %70 = vperm.xlu1 %232, %v361_v19  }
  0x9d   :  { %v245_v51 = vpop.eup %244  ;;  %v61_v9 = vmul.f32 1.442695, %v58_v20 }
  0x9e   :  { %v117_v56 = vadd.f32 %v245_v51, %v243_v50 }
  0xb6   :  { %157 = vadd.xlane.f32.xlu0 %v156_v24 }
 0x116   :  { %v66_v40 = vpop.permute.xlu0 %65 }
 0x117   :  { %v73_v42 = vsub.f32 %v44_v7, %v66_v40 }
 0x119   :  { %v75_v44 = vmul.f32 1.442695, %v73_v42 }
 0x11a   :  { %v71_v46 = vpop.permute.xlu1 %70 }
 0x11b   :  { %246 = vpow2.f32 %v75_v44  ;;  %v74_v47 = vsub.f32 %v329_v8, %v71_v46  ;;  %v59_v8 = vmul.f32 1.442695, %v57_v17  ;;  %v134_v17 = vld [vmem:[#allocation4] sm:$0xff] }
 0x11c   :  { %248 = vrcp.f32 %v112_v43 }
 0x11d   :  { %v77_v48 = vmul.f32 1.442695, %v74_v47  ;;  %250 = vrcp.f32 %v98_v45 }
 0x11f   :  { %252 = vpow2.f32 %v77_v48 }
 0x120   :  { %254 = vpow2.f32 %v59_v8 }
 0x121   :  { %256 = vpow2.f32 %v61_v9 }
 0x125   :  { %v247_v52 = vpop.eup %246 }
 0x126   :  { %v123_v53 = vsel %vm48_vm0, %v247_v52, 0.0  ;;  %v249_v55 = vpop.eup %248  ;;  %v138_v61 = vmul.f32 %v247_v52, %v117_v56 }
 0x127   :  { %124 = vadd.xlane.f32.xlu1 %v123_v53  ;;  %v251_v57 = vpop.eup %250 }
 0x128   :  { %v118_v62 = vadd.f32 %v251_v57, %v249_v55  ;;  %v140_v0 = vsel %vm373_vm4, %v138_v61, 0.0 }
 0x129   :  { %v253_v58 = vpop.eup %252  ;;  %v142_v2 = vsel %vm48_vm0, %v140_v0, 0.0 }
 0x12a   :  { %v126_v60 = vsel %vm48_vm0, %v253_v58, 0.0  ;;  %v139_v1 = vmul.f32 %v253_v58, %v118_v62  ;;  %v255_v10 = vpop.eup %254 }
 0x12b   :  { %127 = vadd.xlane.f32.xlu1 %v126_v60  ;;  %v121_v12 = vmul.f32 %v255_v10, %v119_v11  ;;  %v257_v14 = vpop.eup %256  ;;  %v136_v26 = vmul.f32 %v255_v10, %v134_v17 }
 0x12c   :  { %v141_v3 = vsel %vm388_vm6, %v139_v1, 0.0  ;;  %v122_v23 = vmul.f32 %v257_v14, %v120_v21  ;;  %v137_v31 = vmul.f32 %v257_v14, %v135_v28 }
 0x12d   :  { %v145_v4 = vsel %vm48_vm0, %v141_v3, 0.0 }
 0x12f   :  { %160 = vadd.xlane.f32.xlu1 %v159_v63 }
 0x133   :  { %143 = vadd.xlane.f32.xlu1 %v142_v2 }
 0x137   :  { %146 = vadd.xlane.f32.xlu1 %v145_v4 }
 0x143   :  { %v158_v6 = vpop.xlane.xlu0 %157 }
 0x144   :  { %v162_v7 = vadd.f32 %v158_v6, %v152_v5 }
 0x146   :  { %164 = vst.msk [vmem:[#allocation5] sm:$0xff] %vm19_vm2, %v162_v7 }
 0x14d   :  { %v175_v20 = vld [vmem:[#allocation5] sm:$0xff] }
 0x1b4   :  { %v125_v18 = vpop.xlane.xlu1 %124 }
 0x1b5   :  { %v129_v22 = vadd.f32 %v125_v18, %v121_v12 }
 0x1b7   :  { %132 = vst.msk [vmem:[#allocation3] sm:$0xff] %vm19_vm2, %v129_v22 }
 0x1b8   :  { %v128_v24 = vpop.xlane.xlu1 %127 }
 0x1b9   :  { %v130_v25 = vadd.f32 %v128_v24, %v122_v23 }
 0x1bb   :  { %133 = vst.msk [vmem:[#allocation3 + $0x8] sm:$0xff] %vm19_vm2, %v130_v25 }
 0x1bc   :  { %v161_v15 = vpop.xlane.xlu1 %160 }
 0x1bd   :  { %v163_v16 = vadd.f32 %v161_v15, %v153_v13 }
 0x1be   :  { %v173_v19 = vld [vmem:[#allocation3] sm:$0xff] }
 0x1bf   :  { %165 = vst.msk [vmem:[#allocation5 + $0x8] sm:$0xff] %vm19_vm2, %v163_v16  ;;  %v177_v30 = vmul.f32 %v175_v20, %v173_v19 }
 0x1c0   :  { %v144_v27 = vpop.xlane.xlu1 %143 }
 0x1c1   :  { %v148_v29 = vadd.f32 %v144_v27, %v136_v26  ;;  %258 = vrcp.f32 %v177_v30 }
 0x1c2   :  { %v174_v34 = vld [vmem:[#allocation3 + $0x8] sm:$0xff] }
 0x1c3   :  { %150 = vst.msk [vmem:[#allocation4] sm:$0xff] %vm19_vm2, %v148_v29 }
 0x1c4   :  { %v147_v32 = vpop.xlane.xlu1 %146 }
 0x1c5   :  { %v149_v33 = vadd.f32 %v147_v32, %v137_v31 }
 0x1c6   :  { %v176_v35 = vld [vmem:[#allocation5 + $0x8] sm:$0xff] }
 0x1c7   :  { %151 = vst.msk [vmem:[#allocation4 + $0x8] sm:$0xff] %vm19_vm2, %v149_v33  ;;  %v178_v36 = vmul.f32 %v176_v35, %v174_v34 }
 0x1c9   :  { %260 = vrcp.f32 %v178_v36 }
 0x1ca   :  { %v171_v38 = vld [vmem:[#allocation4] sm:$0xff] }
 0x1cb   :  { %v259_v37 = vpop.eup %258 }
 0x1cc   :  { %v180_v39 = vmul.f32 %v259_v37, %v171_v38 }
 0x1ce   :  { %v172_v41 = vld [vmem:[#allocation4 + $0x8] sm:$0xff]  ;;  %v194_v43 = vsel %vm19_vm2, %v180_v39, 0.0 }
 0x1d3   :  { %v261_v40 = vpop.eup %260 }
 0x1d4   :  { %v182_v42 = vmul.f32 %v261_v40, %v172_v41 }
 0x1d6   :  { %v195_v44 = vsel %vm19_vm2, %v182_v42, 0.0 }
 0x1d7   :  { %v196_v45 = vadd.f32 %v195_v44, %v194_v43 }
 0x1d9   :  { %197 = vadd.xlane.f32.xlu1 %v196_v45 }
 0x266   :  { %v198_v46 = vpop.xlane.xlu1 %197 }
 0x267   :  { %v199_v47 = vrot.slane %v198_v46, 4 }
 0x269   :  { %v200_v48 = vadd.f32 %v199_v47, %v198_v46 }
 0x26b   :  { %v201_v49 = vrot.slane %v200_v48, 2 }
 0x26d   :  { %v202_v50 = vadd.f32 %v201_v49, %v200_v48 }
 0x26f   :  { %v203_v51 = vrot.slane %v202_v50, 1 }
 0x271   :  { %v204_v52 = vadd.f32 %v203_v51, %v202_v50 }
 0x273   :  { %226 = vpush %v204_v52 }
 0x2a4   :  { %s227_s23 = spop %226 }
 0x2a5   :  { %v206_v53 = vstv %s227_s23 }
 0x2a6   :  { %207 = vst [vmem:[#allocation6] sm:$0x1] %v206_v53 }
 0x2a7   :  { %273 = shalt.err (!%p270_p4)
}
 0x2a8   :  { %s274_s28 = scalar_lea.hbm %s432_s3, 16 }
 0x2a9   :  { %p275_p5 = scmp.ne.s32.totalorder %s432_s3, %s274_s28  ;;  %p278_p6 = scmp.lt.u32.totalorder %s274_s28, %s432_s3 }
 0x2ab   :  { %p280_p7 = pnand %p278_p6, %p275_p5 }
 0x2ad   :  { %283 = shalt.err (!%p280_p7)
}
 0x2ae   :  { %217 = dma.vmem_to_hbm [thread:$0]  %s215_s22, 16, %s432_s3, [#allocation7]  }
 0x2af   :  { %284 = dma.done.wait [#allocation7], 16  }
 0x2b0   :  { %285 = vsyncadd [#allocation7], 4294967280 }
 0x2b1   :  { %221 = vsyncpa [#allocation7], 1 }

</bundles_post_ra>
